<compile_context>
chip_gen: v6e
topology: v6e:2x2x1
jax: 0.10.0
libtpu: 0.0.40
codegen_flags: <defaults>
</compile_context>

<pallas_src>
import functools

import jax
import jax.numpy as jnp
import numpy as np
from jax.experimental import pallas as pl
from jax.experimental.pallas import tpu as pltpu


def _round_up(x: int, m: int) -> int:
    return ((x + m - 1) // m) * m


def _pad2(a, rows: int, cols: int):
    a = jnp.asarray(a, jnp.float32)
    out = jnp.zeros((rows, cols), jnp.float32)
    return out.at[: a.shape[0], : a.shape[1]].set(a)


# ----------------------------- Pallas kernel --------------------------------
def icm_mlp_kernel(x_ref, a_ref, w1_ref, tbl_ref, b1_ref, w2_ref, b2_ref,
                   w3_ref, b3_ref, o_ref, *, compute_dtype):
    """One batch tile: relu(x@W1s + onehot(a)@T + b1) -> relu(.@W2+b2) -> .@W3+b3."""
    cd = compute_dtype
    x = x_ref[...].astype(cd)                         # [bb, D_state]
    a = a_ref[...]                                    # [bb, 1] int32
    bb = x.shape[0]
    n_act = tbl_ref.shape[0]

    # One-hot action selection done in-kernel (VPU compare + tiny MXU matmul)
    # instead of an HBM gather + concat outside the kernel.
    onehot = (a == jax.lax.broadcasted_iota(jnp.int32, (bb, n_act), 1)).astype(cd)

    h1 = (jnp.dot(x, w1_ref[...].astype(cd), preferred_element_type=jnp.float32)
          + jnp.dot(onehot, tbl_ref[...].astype(cd),
                    preferred_element_type=jnp.float32)
          + b1_ref[...])
    h1 = jnp.maximum(h1, 0.0)                         # f32 VPU math (v5e-safe)

    h2 = jnp.dot(h1.astype(cd), w2_ref[...].astype(cd),
                 preferred_element_type=jnp.float32) + b2_ref[...]
    h2 = jnp.maximum(h2, 0.0)

    out = jnp.dot(h2.astype(cd), w3_ref[...].astype(cd),
                  preferred_element_type=jnp.float32) + b3_ref[...]
    o_ref[...] = out.astype(o_ref.dtype)              # lane-dense (padded) store


def icm_forward_mlp(x, action, w1s, tbl, b1, w2, b2, w3, b3, *, block_b,
                    compute_dtype=jnp.float32):
    """Batch-tiled 3-layer MLP with VMEM-resident (constant index_map) weights."""
    B, d_state = x.shape
    h_p = w2.shape[0]
    d_out_p = w3.shape[1]
    n_act = tbl.shape[0]
    assert B % block_b == 0
    grid = (B // block_b,)

    row = lambda cols: pl.BlockSpec((block_b, cols), lambda i: (i, 0))
    resident = lambda arr: pl.BlockSpec(arr.shape, lambda i: (0, 0))

    flops = 2 * B * (d_state * h_p + n_act * h_p + h_p * h_p + h_p * d_out_p)
    bytes_accessed = int(
        sum(a.size * a.dtype.itemsize
            for a in (x, action, w1s, tbl, b1, w2, b2, w3, b3))
        + B * d_out_p * 4)

    return pl.pallas_call(
        functools.partial(icm_mlp_kernel, compute_dtype=compute_dtype),
        out_shape=jax.ShapeDtypeStruct((B, d_out_p), jnp.float32),
        grid=grid,
        in_specs=[row(d_state), row(1)] + [resident(a) for a in
                                           (w1s, tbl, b1, w2, b2, w3, b3)],
        out_specs=row(d_out_p),
        compiler_params=pltpu.CompilerParams(
            dimension_semantics=("parallel",)),       # batch tiles -> 2 TCs on v7x
        cost_estimate=pl.CostEstimate(flops=flops, transcendentals=0,
                                      bytes_accessed=bytes_accessed),
    )(x, action, w1s, tbl, b1, w2, b2, w3, b3)


@functools.partial(jax.jit, static_argnums=(9, 10, 11))
def _icm_apply(latent_state, action, w1s, tbl, b1, w2, b2, w3, b3,
               d_out, block_b, compute_dtype):
    """Single-dispatch forward: flatten + pad batch -> Pallas MLP -> slice."""
    action = action.reshape(-1).astype(jnp.int32)
    B = latent_state.shape[0]
    bb = min(block_b, _round_up(B, 8))
    b_pad = _round_up(B, bb)
    if b_pad != B:
        latent_state = jnp.pad(latent_state, ((0, b_pad - B), (0, 0)))
        action = jnp.pad(action, ((0, b_pad - B),))
    out = icm_forward_mlp(latent_state, action.reshape(-1, 1),
                          w1s, tbl, b1, w2, b2, w3, b3,
                          block_b=bb, compute_dtype=compute_dtype)
    return out[:B, :d_out]


# ----------------------------- Module wrapper --------------------------------
class DiscreteICMForwardModelPallas:
    """Pallas-TPU implementation of DiscreteICMForwardModel.forward."""

    def __init__(self, latent_state_dim, latent_action_dim, num_actions,
                 hidden_size=256, key=None, block_b=512,
                 compute_dtype=jnp.float32):
        if key is None:
            key = jax.random.PRNGKey(0)
        ks = jax.random.split(key, 7)
        d_in = latent_state_dim + latent_action_dim

        def linear_init(kw, kb, fan_in, fan_out):
            # Matches torch.nn.Linear default: U(-1/sqrt(fan_in), 1/sqrt(fan_in))
            bound = 1.0 / np.sqrt(fan_in)
            w = jax.random.uniform(kw, (fan_in, fan_out), jnp.float32, -bound, bound)
            b = jax.random.uniform(kb, (fan_out,), jnp.float32, -bound, bound)
            return w, b

        # nn.Embedding default init: N(0, 1)
        self.emb = jax.random.normal(ks[0], (num_actions, latent_action_dim),
                                     jnp.float32)
        self.w1, self.b1 = linear_init(ks[1], ks[2], d_in, hidden_size)
        self.w2, self.b2 = linear_init(ks[3], ks[4], hidden_size, hidden_size)
        self.w3, self.b3 = linear_init(ks[5], ks[6], hidden_size, latent_state_dim)

        self.latent_state_dim = int(latent_state_dim)
        self.block_b = int(block_b)
        self.compute_dtype = compute_dtype

        # Fold the embedding through the action half of W1:
        #   act_tbl[a] = emb[a] @ W1[latent_state_dim:, :]
        act_tbl = self.emb @ self.w1[latent_state_dim:, :]        # [A, H]

        # Lane-dense, zero-padded kernel parameters (pad cols are exactly 0).
        h_p = _round_up(hidden_size, 128)
        d_out_p = _round_up(latent_state_dim, 128)
        a_p = _round_up(num_actions, 8)
        self._w1s = _pad2(self.w1[:latent_state_dim, :], latent_state_dim, h_p)
        self._tbl = _pad2(act_tbl, a_p, h_p)
        self._b1 = _pad2(self.b1.reshape(1, -1), 1, h_p)
        self._w2 = _pad2(self.w2, h_p, h_p)
        self._b2 = _pad2(self.b2.reshape(1, -1), 1, h_p)
        self._w3 = _pad2(self.w3, h_p, d_out_p)
        self._b3 = _pad2(self.b3.reshape(1, -1), 1, d_out_p)

    def __call__(self, latent_state, action):
        return _icm_apply(latent_state, action,
                          self._w1s, self._tbl, self._b1, self._w2, self._b2,
                          self._w3, self._b3, self.latent_state_dim,
                          self.block_b, self.compute_dtype)

    def reference(self, latent_state, action):
        # Pure-JAX reference implementing the original (unfused) formulation.
        action_embd = jnp.take(self.emb, action.reshape(-1), axis=0)
        x = jnp.concatenate([latent_state, action_embd], axis=-1)
        h1 = jnp.maximum(x @ self.w1 + self.b1, 0.0)
        h2 = jnp.maximum(h1 @ self.w2 + self.b2, 0.0)
        return h2 @ self.w3 + self.b3


# ----------------------------------- Main ------------------------------------
if __name__ == "__main__":
    latent_state_dim = 32
    latent_action_dim = 32
    num_actions = 6
    hidden_size = 256     # PyTorch module default
    batch = 32

    key = jax.random.PRNGKey(0)
    k_param, k_state, k_act = jax.random.split(key, 3)

    model = DiscreteICMForwardModelPallas(
        latent_state_dim, latent_action_dim, num_actions,
        hidden_size=hidden_size, key=k_param)

    latent_state = jax.random.normal(k_state, (batch, latent_state_dim),
                                     jnp.float32)
    action = jax.random.randint(k_act, (batch,), 0, num_actions, jnp.int32)

    out = jax.block_until_ready(model(latent_state, action))
    ref = jax.block_until_ready(model.reference(latent_state, action))

    assert out.shape == (batch, latent_state_dim)
    np.testing.assert_allclose(np.asarray(out), np.asarray(ref),
                               rtol=1e-4, atol=1e-4)

    print("KERNEL_OK")
</pallas_src>

<mosaic_0001>
module attributes {stable_mosaic.version = 11 : i64} {
  func.func @icm_mlp_kernel(%arg0: i32, %arg1: memref<32x32xf32, #tpu.memory_space<vmem>>, %arg2: memref<32x1xi32, #tpu.memory_space<vmem>>, %arg3: memref<32x256xf32, #tpu.memory_space<vmem>>, %arg4: memref<8x256xf32, #tpu.memory_space<vmem>>, %arg5: memref<1x256xf32, #tpu.memory_space<vmem>>, %arg6: memref<256x256xf32, #tpu.memory_space<vmem>>, %arg7: memref<1x256xf32, #tpu.memory_space<vmem>>, %arg8: memref<256x128xf32, #tpu.memory_space<vmem>>, %arg9: memref<1x128xf32, #tpu.memory_space<vmem>>, %arg10: memref<32x128xf32, #tpu.memory_space<vmem>>) attributes {dimension_semantics = [#tpu.dimension_semantics<parallel>], iteration_bounds = array<i64: 1>, scalar_prefetch = 0 : i64, scratch_operands = 0 : i64, tpu.core_type = #tpu.core_type<tc>, window_params = [{transform_indices = @transform_0, window_bounds = array<i64: 32, 32>}, {transform_indices = @transform_1, window_bounds = array<i64: 32, 1>}, {pipeline_mode = #tpu.pipeline_mode<synchronous>, transform_indices = @transform_2, window_bounds = array<i64: 32, 256>}, {pipeline_mode = #tpu.pipeline_mode<synchronous>, transform_indices = @transform_3, window_bounds = array<i64: 8, 256>}, {pipeline_mode = #tpu.pipeline_mode<synchronous>, transform_indices = @transform_4, window_bounds = array<i64: 1, 256>}, {pipeline_mode = #tpu.pipeline_mode<synchronous>, transform_indices = @transform_5, window_bounds = array<i64: 256, 256>}, {pipeline_mode = #tpu.pipeline_mode<synchronous>, transform_indices = @transform_6, window_bounds = array<i64: 1, 256>}, {pipeline_mode = #tpu.pipeline_mode<synchronous>, transform_indices = @transform_7, window_bounds = array<i64: 256, 128>}, {pipeline_mode = #tpu.pipeline_mode<synchronous>, transform_indices = @transform_8, window_bounds = array<i64: 1, 128>}, {transform_indices = @transform_9, window_bounds = array<i64: 32, 128>}]} {
    %c0 = arith.constant 0 : index
    %c0_0 = arith.constant 0 : index
    %0 = vector.load %arg1[%c0, %c0_0] : memref<32x32xf32, #tpu.memory_space<vmem>>, vector<32x32xf32>
    %c0_1 = arith.constant 0 : index
    %c0_2 = arith.constant 0 : index
    %1 = vector.load %arg2[%c0_1, %c0_2] : memref<32x1xi32, #tpu.memory_space<vmem>>, vector<32x1xi32>
    %2 = tpu.iota {dimensions = array<i32: 1>} : vector<32x8xi32>
    %3 = vector.broadcast %1 : vector<32x1xi32> to vector<32x8xi32>
    %4 = arith.cmpi eq, %3, %2 : vector<32x8xi32>
    %5 = arith.extui %4 : vector<32x8xi1> to vector<32x8xi32>
    %6 = arith.sitofp %5 : vector<32x8xi32> to vector<32x8xf32>
    %c0_3 = arith.constant 0 : index
    %c0_4 = arith.constant 0 : index
    %7 = vector.load %arg3[%c0_3, %c0_4] : memref<32x256xf32, #tpu.memory_space<vmem>>, vector<32x256xf32>
    %cst = arith.constant dense<0.000000e+00> : vector<32x256xf32>
    %8 = tpu.matmul %0, %7, %cst {dimension_numbers = #tpu.dot_dimension_numbers<[1], [0], [0], [1], [0, 0, 1, 1], [], []>} : vector<32x32xf32>, vector<32x256xf32>, vector<32x256xf32> -> vector<32x256xf32>
    %c0_5 = arith.constant 0 : index
    %c0_6 = arith.constant 0 : index
    %9 = vector.load %arg4[%c0_5, %c0_6] : memref<8x256xf32, #tpu.memory_space<vmem>>, vector<8x256xf32>
    %cst_7 = arith.constant dense<0.000000e+00> : vector<32x256xf32>
    %10 = tpu.matmul %6, %9, %cst_7 {dimension_numbers = #tpu.dot_dimension_numbers<[1], [0], [0], [1], [0, 0, 1, 1], [], []>} : vector<32x8xf32>, vector<8x256xf32>, vector<32x256xf32> -> vector<32x256xf32>
    %11 = arith.addf %8, %10 : vector<32x256xf32>
    %c0_8 = arith.constant 0 : index
    %c0_9 = arith.constant 0 : index
    %12 = vector.load %arg5[%c0_8, %c0_9] : memref<1x256xf32, #tpu.memory_space<vmem>>, vector<1x256xf32>
    %13 = vector.broadcast %12 : vector<1x256xf32> to vector<32x256xf32>
    %14 = arith.addf %11, %13 : vector<32x256xf32>
    %cst_10 = arith.constant 0.000000e+00 : f32
    %15 = vector.broadcast %cst_10 : f32 to vector<32x256xf32>
    %16 = arith.maximumf %14, %15 : vector<32x256xf32>
    %c0_11 = arith.constant 0 : index
    %c0_12 = arith.constant 0 : index
    %17 = vector.load %arg6[%c0_11, %c0_12] : memref<256x256xf32, #tpu.memory_space<vmem>>, vector<256x256xf32>
    %cst_13 = arith.constant dense<0.000000e+00> : vector<32x256xf32>
    %18 = tpu.matmul %16, %17, %cst_13 {dimension_numbers = #tpu.dot_dimension_numbers<[1], [0], [0], [1], [0, 0, 1, 1], [], []>} : vector<32x256xf32>, vector<256x256xf32>, vector<32x256xf32> -> vector<32x256xf32>
    %c0_14 = arith.constant 0 : index
    %c0_15 = arith.constant 0 : index
    %19 = vector.load %arg7[%c0_14, %c0_15] : memref<1x256xf32, #tpu.memory_space<vmem>>, vector<1x256xf32>
    %20 = vector.broadcast %19 : vector<1x256xf32> to vector<32x256xf32>
    %21 = arith.addf %18, %20 : vector<32x256xf32>
    %cst_16 = arith.constant 0.000000e+00 : f32
    %22 = vector.broadcast %cst_16 : f32 to vector<32x256xf32>
    %23 = arith.maximumf %21, %22 : vector<32x256xf32>
    %c0_17 = arith.constant 0 : index
    %c0_18 = arith.constant 0 : index
    %24 = vector.load %arg8[%c0_17, %c0_18] : memref<256x128xf32, #tpu.memory_space<vmem>>, vector<256x128xf32>
    %cst_19 = arith.constant dense<0.000000e+00> : vector<32x128xf32>
    %25 = tpu.matmul %23, %24, %cst_19 {dimension_numbers = #tpu.dot_dimension_numbers<[1], [0], [0], [1], [0, 0, 1, 1], [], []>} : vector<32x256xf32>, vector<256x128xf32>, vector<32x128xf32> -> vector<32x128xf32>
    %c0_20 = arith.constant 0 : index
    %c0_21 = arith.constant 0 : index
    %26 = vector.load %arg9[%c0_20, %c0_21] : memref<1x128xf32, #tpu.memory_space<vmem>>, vector<1x128xf32>
    %27 = vector.broadcast %26 : vector<1x128xf32> to vector<32x128xf32>
    %28 = arith.addf %25, %27 : vector<32x128xf32>
    %c0_22 = arith.constant 0 : index
    %c0_23 = arith.constant 0 : index
    %29 = vector.load %arg10[%c0_22, %c0_23] : memref<32x128xf32, #tpu.memory_space<vmem>>, vector<32x128xf32>
    tpu.vector_store %arg10[%c0_22, %c0_23], %28 {strides = array<i32>} : memref<32x128xf32, #tpu.memory_space<vmem>>, vector<32x128xf32>,
    return
  }
  func.func @transform_0(%arg0: i32) -> (i32, i32) {
    %c0_i32 = arith.constant 0 : i32
    %c0_i32_0 = arith.constant 0 : i32
    return %arg0, %c0_i32 : i32, i32
  }
  func.func @transform_1(%arg0: i32) -> (i32, i32) {
    %c0_i32 = arith.constant 0 : i32
    %c0_i32_0 = arith.constant 0 : i32
    return %arg0, %c0_i32 : i32, i32
  }
  func.func @transform_2(%arg0: i32) -> (i32, i32) {
    %c0_i32 = arith.constant 0 : i32
    %c0_i32_0 = arith.constant 0 : i32
    %c0_i32_1 = arith.constant 0 : i32
    return %c0_i32, %c0_i32_0 : i32, i32
  }
  func.func @transform_3(%arg0: i32) -> (i32, i32) {
    %c0_i32 = arith.constant 0 : i32
    %c0_i32_0 = arith.constant 0 : i32
    %c0_i32_1 = arith.constant 0 : i32
    return %c0_i32, %c0_i32_0 : i32, i32
  }
  func.func @transform_4(%arg0: i32) -> (i32, i32) {
    %c0_i32 = arith.constant 0 : i32
    %c0_i32_0 = arith.constant 0 : i32
    %c0_i32_1 = arith.constant 0 : i32
    return %c0_i32, %c0_i32_0 : i32, i32
  }
  func.func @transform_5(%arg0: i32) -> (i32, i32) {
    %c0_i32 = arith.constant 0 : i32
    %c0_i32_0 = arith.constant 0 : i32
    %c0_i32_1 = arith.constant 0 : i32
    return %c0_i32, %c0_i32_0 : i32, i32
  }
  func.func @transform_6(%arg0: i32) -> (i32, i32) {
    %c0_i32 = arith.constant 0 : i32
    %c0_i32_0 = arith.constant 0 : i32
    %c0_i32_1 = arith.constant 0 : i32
    return %c0_i32, %c0_i32_0 : i32, i32
  }
  func.func @transform_7(%arg0: i32) -> (i32, i32) {
    %c0_i32 = arith.constant 0 : i32
    %c0_i32_0 = arith.constant 0 : i32
    %c0_i32_1 = arith.constant 0 : i32
    return %c0_i32, %c0_i32_0 : i32, i32
  }
  func.func @transform_8(%arg0: i32) -> (i32, i32) {
    %c0_i32 = arith.constant 0 : i32
    %c0_i32_0 = arith.constant 0 : i32
    %c0_i32_1 = arith.constant 0 : i32
    return %c0_i32, %c0_i32_0 : i32, i32
  }
  func.func @transform_9(%arg0: i32) -> (i32, i32) {
    %c0_i32 = arith.constant 0 : i32
    %c0_i32_0 = arith.constant 0 : i32
    return %arg0, %c0_i32 : i32, i32
  }
}

</mosaic_0001>

<bundles_post_ra>
// kernel: _icm_apply.1
= control target key start
LH: loop header
LB: loop body
LE: loop exit
PB: predicated region body
PF: predicated region fallthrough
CT: control target
= control target key end

     0   :  { %14 = vsyncpa [#allocation3], 0  ;;  %s1001_s0 = inlined_call_operand.vmem [shape: f32[32,32], index: 0, kind: input, shape index: {}]   ;;  %s1002_s1 = inlined_call_operand.vmem [shape: s32[32,1], index: 1, kind: input, shape index: {}]   ;;  %s1003_s2 = inlined_call_operand.hbm [shape: f32[32,256], index: 2, kind: input, shape index: {}]   ;;  %s1004_s3 = inlined_call_operand.hbm [shape: f32[8,256], index: 3, kind: input, shape index: {}]   ;;  %s1005_s4 = inlined_call_operand.vmem [shape: f32[1,256], index: 4, kind: input, shape index: {}]   ;;  %s1006_s5 = inlined_call_operand.hbm [shape: f32[256,256], index: 5, kind: input, shape index: {}]   ;;  %s1007_s6 = inlined_call_operand.vmem [shape: f32[1,256], index: 6, kind: input, shape index: {}]   ;;  %s1008_s7 = inlined_call_operand.hbm [shape: f32[256,128], index: 7, kind: input, shape index: {}]   ;;  %s1009_s8 = inlined_call_operand.vmem [shape: f32[1,128], index: 8, kind: input, shape index: {}]   ;;  %s1010_s9 = inlined_call_operand.hbm [shape: f32[32,128], index: 9, kind: output, shape index: {}]  }
   0x1   :  { %15 = vsyncpa [#allocation6], 0 }
   0x2   :  { %16 = vsyncpa [#allocation9], 0 }
   0x3   :  { %17 = vsyncpa [#allocation4], 0  ;;  %s860_s30 = smov [#allocation5]   ;;  %s861_s11 = smov [#allocation2]  }
   0x4   :  { %s40_s10 = sshll.u32 %s860_s30, 4  ;;  %s27_s12 = sshll.u32 %s861_s11, 4  ;;  %s41_s10 = int_to_ptr.vmem [resolvable:$true] %s40_s10  ;;  %s28_s12 = int_to_ptr.vmem [resolvable:$true] %s27_s12 }
   0x5   :  { %s760_s13 = scalar_lea.vmem %s41_s10, 256  ;;  %p765_p1 = scmp.lt.s32.totalorder %s41_s10, %s41_s10 }
   0x6   :  { %p761_p0 = scmp.ne.s32.totalorder %s41_s10, %s760_s13  ;;  %p766_p2 = scmp.lt.s32.totalorder %s760_s13, %s760_s13 }
   0x8   :  { %p767_p3 = por %p766_p2, %p765_p1 }
   0xa   :  { %p768_p4 = pnand %p767_p3, %p761_p0 }
   0xc   :  { %771 = shalt.err (!%p768_p4)
}
   0xd   :  { %43 = dma.hbm_to_vmem [thread:$0]  %s1004_s3, 256, %s41_s10, [#allocation6]  }
   0xe   :  { %s780_s16 = scalar_lea.vmem %s28_s12, 1024  ;;  %p785_p6 = scmp.lt.s32.totalorder %s28_s12, %s28_s12 }
   0xf   :  { %p781_p5 = scmp.ne.s32.totalorder %s28_s12, %s780_s16  ;;  %p786_p7 = scmp.lt.s32.totalorder %s780_s16, %s780_s16 }
  0x11   :  { %p787_p8 = por %p786_p7, %p785_p6 }
  0x13   :  { %p788_p9 = pnand %p787_p8, %p781_p5 }
  0x15   :  { %791 = shalt.err (!%p788_p9)
}
  0x16   :  { %s862_s17 = smov 256   ;;  %s863_s18 = smov 16  }
  0x17   :  { %33 = dma.hbm_to_vmem [thread:$0]  %s1003_s2, 1024, %s28_s12, [#allocation3], %s862_s17, %s862_s17, %s863_s18  }
  0x18   :  { %s864_s21 = smov [#allocation7]   ;;  %s865_s23 = smov [#allocation8]  }
  0x19   :  { %s51_s22 = sshll.u32 %s864_s21, 4  ;;  %s65_s24 = sshll.u32 %s865_s23, 4  ;;  %s52_s22 = int_to_ptr.vmem [resolvable:$true] %s51_s22  ;;  %s66_s24 = int_to_ptr.vmem [resolvable:$true] %s65_s24 }
  0x1a   :  { %s800_s3 = scalar_lea.vmem %s52_s22, 8192  ;;  %p805_p11 = scmp.lt.s32.totalorder %s52_s22, %s52_s22 }
  0x1b   :  { %p801_p10 = scmp.ne.s32.totalorder %s52_s22, %s800_s3  ;;  %p806_p12 = scmp.lt.s32.totalorder %s800_s3, %s800_s3 }
  0x1d   :  { %p807_p13 = por %p806_p12, %p805_p11 }
  0x1f   :  { %p808_p0 = pnand %p807_p13, %p801_p10 }
  0x21   :  { %811 = shalt.err (!%p808_p0)
}
  0x22   :  { %57 = dma.hbm_to_vmem [thread:$0]  %s1006_s5, 8192, %s52_s22, [#allocation6], %s862_s17, %s862_s17, %s863_s18  }
  0x23   :  { %s820_s27 = scalar_lea.vmem %s66_s24, 4096  ;;  %p825_p2 = scmp.lt.s32.totalorder %s66_s24, %s66_s24 }
  0x24   :  { %p821_p1 = scmp.ne.s32.totalorder %s66_s24, %s820_s27  ;;  %p826_p3 = scmp.lt.s32.totalorder %s820_s27, %s820_s27 }
  0x26   :  { %p827_p4 = por %p826_p3, %p825_p2 }
  0x28   :  { %p828_p5 = pnand %p827_p4, %p821_p1 }
  0x2a   :  { %831 = shalt.err (!%p828_p5)
}
  0x2b   :  { %s866_s2 = smov 128   ;;  %s867_s28 = smov 8  }
  0x2c   :  { %71 = dma.hbm_to_vmem [thread:$0]  %s1008_s7, 4096, %s66_s24, [#allocation9], %s866_s2, %s866_s2, %s867_s28  }
  0x2d   :  { %852 = dma.done.wait [#allocation3], 1024  }
  0x2e   :  { %853 = vsyncadd [#allocation3], 4294966272 }
  0x2f   :  { %854 = dma.done.wait [#allocation6], 8448  }
  0x30   :  { %855 = vsyncadd [#allocation6], 4294958848 }
  0x31   :  { %856 = dma.done.wait [#allocation9], 4096  }
  0x32   :  { %857 = vsyncadd [#allocation9], 4294963200  ;;  %v868_v0 = vmov 0   ;;  %v869_v1 = vmov 0.0   ;;  %v90_v2 = vld [vmem:[%s1002_s1] sm:$0xff]  ;;  %v92_v3 = vld [vmem:[%s1002_s1 + $0x10] sm:$0xff]  ;;  %v94_v47 = vlaneseq }
  0x33   :  { %750 = vset.pattern.permute.xlu0 %v868_v0  ;;  %751 = vset.pattern.permute.xlu1 %v868_v0  ;;  %v129_v4 = vld [vmem:[#allocation5 + $0x8] sm:$0xff]  ;;  %v128_v5 = vld [vmem:[#allocation5] sm:$0xff]  ;;  %v93_v7 = vld [vmem:[%s1002_s1 + $0x18] sm:$0xff]  ;;  %vm130_vm0 = vcmask 64512   ;;  %vm232_vm5 = vcmask 261120   ;;  %s870_s25 = smov [#allocation10]  }
  0x34   :  { %207 = vmatprep.mubr.f32.mxu1 %v869_v1  ;;  %97 = vperm.xlu0 %750, %v90_v2   ;;  %v91_v6 = vld [vmem:[%s1002_s1 + $0x8] sm:$0xff]  ;;  %v127_v8 = vld [vmem:[#allocation2 + $0x38] sm:$0xff]  ;;  %v392_v10 = vld [vmem:[#allocation7 + $0xf0] sm:$0xff]  ;;  %v95_v48 = vand.u32 127, %v94_v47  ;;  %s668_s26 = sshll.u32 %s870_s25, 4  ;;  %s669_s26 = int_to_ptr.vmem [resolvable:$true] %s668_s26 }
  0x35   :  { %103 = vperm.xlu1 %751, %v92_v3   ;;  %173 = vmatprep.subr.mxu1 %v129_v4  ;;  %v393_v9 = vld [vmem:[#allocation7 + $0xf8] sm:$0xff]  ;;  %v391_v11 = vld [vmem:[#allocation7 + $0xe8] sm:$0xff]  ;;  %v390_v12 = vld [vmem:[#allocation7 + $0xe0] sm:$0xff]  ;;  %p837_p7 = scmp.lt.s32.totalorder %s669_s26, %s669_s26 }
  0x36   :  { %174 = vmatpush1.msra.mxu1 %v128_v5  ;;  %438 = vmatprep.subr.mxu0 %v393_v9  ;;  %v389_v13 = vld [vmem:[#allocation7 + $0xd8] sm:$0xff]  ;;  %v388_v14 = vld [vmem:[#allocation7 + $0xd0] sm:$0xff]  ;;  %v387_v15 = vld [vmem:[#allocation7 + $0xc8] sm:$0xff] }
  0x37   :  { %269 = vmatprep.subr.mxu1 %v127_v8  ;;  %439 = vmatpush1.msra.mxu0 %v392_v10  ;;  %v386_v16 = vld [vmem:[#allocation7 + $0xc0] sm:$0xff]  ;;  %v385_v17 = vld [vmem:[#allocation7 + $0xb8] sm:$0xff]  ;;  %v384_v18 = vld [vmem:[#allocation7 + $0xb0] sm:$0xff] }
  0x38   :  { %100 = vperm.xlu0 %750, %v91_v6   ;;  %440 = vmatprep.subr.mxu0 %v391_v11  ;;  %v383_v19 = vld [vmem:[#allocation7 + $0xa8] sm:$0xff]  ;;  %v382_v20 = vld [vmem:[#allocation7 + $0xa0] sm:$0xff]  ;;  %v381_v21 = vld [vmem:[#allocation7 + $0x98] sm:$0xff] }
  0x39   :  { %106 = vperm.xlu1 %751, %v93_v7   ;;  %441 = vmatpush1.msra.mxu0 %v390_v12  ;;  %v380_v22 = vld [vmem:[#allocation7 + $0x90] sm:$0xff]  ;;  %v379_v23 = vld [vmem:[#allocation7 + $0x88] sm:$0xff]  ;;  %v378_v24 = vld [vmem:[#allocation7 + $0x80] sm:$0xff] }
  0x3a   :  { %442 = vmatprep.subr.mxu0 %v389_v13  ;;  %v377_v25 = vld [vmem:[#allocation7 + $0x78] sm:$0xff]  ;;  %v376_v26 = vld [vmem:[#allocation7 + $0x70] sm:$0xff]  ;;  %v375_v27 = vld [vmem:[#allocation7 + $0x68] sm:$0xff] }
  0x3b   :  { %443 = vmatpush1.msra.mxu0 %v388_v14  ;;  %v374_v28 = vld [vmem:[#allocation7 + $0x60] sm:$0xff]  ;;  %v373_v29 = vld [vmem:[#allocation7 + $0x58] sm:$0xff]  ;;  %v372_v30 = vld [vmem:[#allocation7 + $0x50] sm:$0xff] }
  0x3c   :  { %444 = vmatprep.subr.mxu0 %v387_v15  ;;  %v371_v31 = vld [vmem:[#allocation7 + $0x48] sm:$0xff]  ;;  %v370_v32 = vld [vmem:[#allocation7 + $0x40] sm:$0xff]  ;;  %v369_v33 = vld [vmem:[#allocation7 + $0x38] sm:$0xff] }
  0x3d   :  { %445 = vmatpush1.msra.mxu0 %v386_v16  ;;  %v368_v34 = vld [vmem:[#allocation7 + $0x30] sm:$0xff]  ;;  %v367_v35 = vld [vmem:[#allocation7 + $0x28] sm:$0xff]  ;;  %v366_v36 = vld [vmem:[#allocation7 + $0x20] sm:$0xff] }
  0x3e   :  { %446 = vmatprep.subr.mxu0 %v385_v17  ;;  %v365_v37 = vld [vmem:[#allocation7 + $0x18] sm:$0xff]  ;;  %v364_v38 = vld [vmem:[#allocation7 + $0x10] sm:$0xff]  ;;  %v363_v39 = vld [vmem:[#allocation7 + $0x8] sm:$0xff] }
  0x3f   :  { %447 = vmatpush1.msra.mxu0 %v384_v18  ;;  %v362_v40 = vld [vmem:[#allocation7] sm:$0xff]  ;;  %v425_v41 = vld [vmem:[#allocation7 + $0x1f8] sm:$0xff]  ;;  %v424_v42 = vld [vmem:[#allocation7 + $0x1f0] sm:$0xff] }
  0x40   :  { %448 = vmatprep.subr.mxu0 %v383_v19  ;;  %v423_v43 = vld [vmem:[#allocation7 + $0x1e8] sm:$0xff]  ;;  %v422_v44 = vld [vmem:[#allocation7 + $0x1e0] sm:$0xff]  ;;  %v421_v45 = vld [vmem:[#allocation7 + $0x1d8] sm:$0xff] }
  0x41   :  { %449 = vmatpush1.msra.mxu0 %v382_v20  ;;  %v420_v46 = vld [vmem:[#allocation7 + $0x1d0] sm:$0xff]  ;;  %v126_v50 = vld [vmem:[#allocation2 + $0x30] sm:$0xff]  ;;  %v125_v53 = vld [vmem:[#allocation2 + $0x28] sm:$0xff] }
  0x42   :  { %450 = vmatprep.subr.mxu0 %v381_v21  ;;  %v124_v54 = vld [vmem:[#allocation2 + $0x20] sm:$0xff]  ;;  %v123_v56 = vld [vmem:[#allocation2 + $0x18] sm:$0xff]  ;;  %v122_v57 = vld [vmem:[#allocation2 + $0x10] sm:$0xff] }
  0x43   :  { %451 = vmatpush1.msra.mxu0 %v380_v22  ;;  %v121_v59 = vld [vmem:[#allocation2 + $0x8] sm:$0xff]  ;;  %v120_v60 = vld [vmem:[#allocation2] sm:$0xff]  ;;  %v88_v3 = vld [vmem:[%s1001_s0 + $0x10] sm:$0xff] }
  0x44   :  { %452 = vmatprep.subr.mxu0 %v379_v23  ;;  %v86_v0 = vld [vmem:[%s1001_s0] sm:$0xff]  ;;  %v87_v2 = vld [vmem:[%s1001_s0 + $0x8] sm:$0xff]  ;;  %v89_v4 = vld [vmem:[%s1001_s0 + $0x18] sm:$0xff] }
  0x45   :  { %453 = vmatpush1.msra.mxu0 %v378_v24  ;;  %v419_v5 = vld [vmem:[#allocation7 + $0x1c8] sm:$0xff]  ;;  %v418_v6 = vld [vmem:[#allocation7 + $0x1c0] sm:$0xff]  ;;  %v417_v7 = vld [vmem:[#allocation7 + $0x1b8] sm:$0xff] }
  0x46   :  { %454 = vmatprep.subr.mxu0 %v377_v25  ;;  %v416_v8 = vld [vmem:[#allocation7 + $0x1b0] sm:$0xff]  ;;  %v415_v9 = vld [vmem:[#allocation7 + $0x1a8] sm:$0xff]  ;;  %v414_v10 = vld [vmem:[#allocation7 + $0x1a0] sm:$0xff] }
  0x47   :  { %455 = vmatpush1.msra.mxu0 %v376_v26  ;;  %v413_v11 = vld [vmem:[#allocation7 + $0x198] sm:$0xff]  ;;  %v411_v12 = vld [vmem:[#allocation7 + $0x188] sm:$0xff]  ;;  %v410_v13 = vld [vmem:[#allocation7 + $0x180] sm:$0xff] }
  0x48   :  { %456 = vmatprep.subr.mxu0 %v375_v27  ;;  %v409_v14 = vld [vmem:[#allocation7 + $0x178] sm:$0xff]  ;;  %v408_v15 = vld [vmem:[#allocation7 + $0x170] sm:$0xff]  ;;  %v407_v16 = vld [vmem:[#allocation7 + $0x168] sm:$0xff] }
  0x49   :  { %457 = vmatpush1.msra.mxu0 %v374_v28  ;;  %v406_v17 = vld [vmem:[#allocation7 + $0x160] sm:$0xff]  ;;  %v405_v18 = vld [vmem:[#allocation7 + $0x158] sm:$0xff]  ;;  %v404_v19 = vld [vmem:[#allocation7 + $0x150] sm:$0xff] }
  0x4a   :  { %458 = vmatprep.subr.mxu0 %v373_v29  ;;  %v403_v20 = vld [vmem:[#allocation7 + $0x148] sm:$0xff]  ;;  %v402_v21 = vld [vmem:[#allocation7 + $0x140] sm:$0xff]  ;;  %v401_v22 = vld [vmem:[#allocation7 + $0x138] sm:$0xff] }
  0x4b   :  { %459 = vmatpush1.msra.mxu0 %v372_v30  ;;  %v400_v23 = vld [vmem:[#allocation7 + $0x130] sm:$0xff]  ;;  %v399_v24 = vld [vmem:[#allocation7 + $0x128] sm:$0xff]  ;;  %v398_v25 = vld [vmem:[#allocation7 + $0x120] sm:$0xff] }
  0x4c   :  { %460 = vmatprep.subr.mxu0 %v371_v31  ;;  %v397_v26 = vld [vmem:[#allocation7 + $0x118] sm:$0xff]  ;;  %v396_v27 = vld [vmem:[#allocation7 + $0x110] sm:$0xff]  ;;  %v395_v28 = vld [vmem:[#allocation7 + $0x108] sm:$0xff] }
  0x4d   :  { %461 = vmatpush1.msra.mxu0 %v370_v32  ;;  %v394_v29 = vld [vmem:[#allocation7 + $0x100] sm:$0xff]  ;;  %v566_v30 = vld [vmem:[#allocation8 + $0xf8] sm:$0xff]  ;;  %v565_v32 = vld [vmem:[#allocation8 + $0xf0] sm:$0xff] }
  0x4e   :  { %462 = vmatprep.subr.mxu0 %v369_v33  ;;  %v550_v31 = vld [vmem:[#allocation8 + $0x78] sm:$0xff]  ;;  %v549_v33 = vld [vmem:[#allocation8 + $0x70] sm:$0xff] }
  0x4f   :  { %463 = vmatpush1.msra.mxu0 %v368_v34  ;;  %v564_v34 = vld [vmem:[#allocation8 + $0xe8] sm:$0xff] }
  0x50   :  { %464 = vmatprep.subr.mxu0 %v367_v35  ;;  %v548_v35 = vld [vmem:[#allocation8 + $0x68] sm:$0xff] }
  0x51   :  { %465 = vmatpush1.msra.mxu0 %v366_v36  ;;  %v563_v36 = vld [vmem:[#allocation8 + $0xe0] sm:$0xff] }
  0x52   :  { %466 = vmatprep.subr.mxu0 %v365_v37  ;;  %v547_v37 = vld [vmem:[#allocation8 + $0x60] sm:$0xff] }
  0x53   :  { %467 = vmatpush1.msra.mxu0 %v364_v38  ;;  %v562_v38 = vld [vmem:[#allocation8 + $0xd8] sm:$0xff] }
  0x54   :  { %468 = vmatprep.subr.mxu0 %v363_v39  ;;  %v546_v39 = vld [vmem:[#allocation8 + $0x58] sm:$0xff] }
  0x55   :  { %469 = vmatpush1.msra.mxu0 %v362_v40  ;;  %v561_v40 = vld [vmem:[#allocation8 + $0xd0] sm:$0xff] }
  0x56   :  { %470 = vmatprep.subr.mxu0 %v425_v41  ;;  %v545_v41 = vld [vmem:[#allocation8 + $0x50] sm:$0xff] }
  0x57   :  { %471 = vmatpush2.msra.mxu0 %v424_v42  ;;  %v560_v42 = vld [vmem:[#allocation8 + $0xc8] sm:$0xff] }
  0x58   :  { %472 = vmatprep.subr.mxu0 %v423_v43  ;;  %v544_v43 = vld [vmem:[#allocation8 + $0x48] sm:$0xff] }
  0x59   :  { %473 = vmatpush2.msra.mxu0 %v422_v44  ;;  %v559_v44 = vld [vmem:[#allocation8 + $0xc0] sm:$0xff] }
  0x5a   :  { %474 = vmatprep.subr.mxu0 %v421_v45  ;;  %v543_v45 = vld [vmem:[#allocation8 + $0x40] sm:$0xff] }
  0x5b   :  { %475 = vmatpush2.msra.mxu0 %v420_v46  ;;  %v558_v46 = vld [vmem:[#allocation8 + $0xb8] sm:$0xff] }
  0x5c   :  { %476 = vmatprep.subr.mxu0 %v419_v5 }
  0x5d   :  { %477 = vmatpush2.msra.mxu0 %v418_v6 }
  0x5e   :  { %478 = vmatprep.subr.mxu0 %v417_v7 }
  0x5f   :  { %479 = vmatpush2.msra.mxu0 %v416_v8 }
  0x60   :  { %480 = vmatprep.subr.mxu0 %v415_v9 }
  0x61   :  { %481 = vmatpush2.msra.mxu0 %v414_v10 }
  0x62   :  { %482 = vmatprep.subr.mxu0 %v413_v11 }
  0xaf   :  { %v98_v49 = vpop.permute.xlu0 %97 }
  0xb0   :  { %vm108_vm1 = vcmp.eq.s32.totalorder %v98_v49, %v95_v48  ;;  %v104_v52 = vpop.permute.xlu1 %103  ;;  %v557_v49 = vld [vmem:[#allocation8 + $0xb0] sm:$0xff] }
  0xb1   :  { %v682_v51 = vsel %vm108_vm1, 1.0, %v869_v1  ;;  %vm110_vm2 = vcmp.eq.s32.totalorder %v104_v52, %v95_v48  ;;  %v540_v52 = vld [vmem:[#allocation8 + $0x28] sm:$0xff] }
  0xb2   :  { %686 = vmatmul.mubr.msk.f32.vlgmr.msra.gmra.mxu1 %vm130_vm0, %v682_v51  ;;  %v684_v61 = vsel %vm110_vm2, 1.0, %v869_v1  ;;  %v556_v51 = vld [vmem:[#allocation8 + $0xa8] sm:$0xff] }
  0xb3   :  { %270 = vmatpush1.msra.mxu1 %v126_v50  ;;  %v101_v55 = vpop.permute.xlu0 %100  ;;  %213 = vmatprep.mubr.f32.mxu1 %v869_v1  ;;  %v541_v50 = vld [vmem:[#allocation8 + $0x30] sm:$0xff] }
  0xb4   :  { %vm109_vm3 = vcmp.eq.s32.totalorder %v101_v55, %v95_v48  ;;  %271 = vmatprep.subr.mxu1 %v125_v53  ;;  %v107_v62 = vpop.permute.xlu1 %106  ;;  %v555_v53 = vld [vmem:[#allocation8 + $0xa0] sm:$0xff] }
  0xb5   :  { %v683_v58 = vsel %vm109_vm3, 1.0, %v869_v1  ;;  %272 = vmatpush1.msra.mxu1 %v124_v54  ;;  %vm111_vm4 = vcmp.eq.s32.totalorder %v107_v62, %v95_v48  ;;  %v542_v48 = vld [vmem:[#allocation8 + $0x38] sm:$0xff]  ;;  %v539_v54 = vld [vmem:[#allocation8 + $0x20] sm:$0xff] }
  0xb6   :  { %687 = vmatmul.mubr.msk.f32.gmra.mxu1 %vm130_vm0, %v683_v58  ;;  %273 = vmatprep.subr.mxu1 %v123_v56  ;;  %v685_v63 = vsel %vm111_vm4, 1.0, %v869_v1 }
  0xb7   :  { %219 = vmatprep.mubr.f32.mxu1 %v869_v1  ;;  %274 = vmatpush1.msra.mxu1 %v122_v57 }
  0xb8   :  { %275 = vmatprep.subr.mxu1 %v121_v59  ;;  %v978_v59 = vshrl.u32 %v94_v47, 7 }
  0xb9   :  { %276 = vmatpush1.msra.mxu1 %v120_v60 }
  0xba   :  { %688 = vmatmul.mubr.msk.f32.gmra.mxu1 %vm130_vm0, %v684_v61  ;;  %695 = vmatprep.subr.mxu1 %v566_v30 }
  0xbb   :  { %225 = vmatprep.mubr.f32.mxu1 %v869_v1 }
  0xbe   :  { %689 = vmatmul.mubr.msk.f32.gmra.mxu1 %vm130_vm0, %v685_v63  ;;  %v338_v63 = vsub.s32 0, %v978_v59 }
  0xbf   :  { %309 = vmatprep.mubr.f32.mxu1 %v869_v1 }
  0xc2   :  { %690 = vmatmul.mubr.msk.f32.vlgmr.msra.gmra.mxu1 %vm232_vm5, %v86_v0  ;;  %v334_v0 = vld [vmem:[%s1005_s4] sm:$0x3] }
  0xc3   :  { %315 = vmatprep.mubr.f32.mxu1 %v869_v1  ;;  %696 = vmatpush3.msra.mxu1 %v550_v31  ;;  %v339_v5 = vrot.slane %v334_v0, %v338_v63 }
  0xc4   :  { %697 = vmatprep.subr.mxu1 %v565_v32 }
  0xc5   :  { %698 = vmatpush3.msra.mxu1 %v549_v33 }
  0xc6   :  { %691 = vmatmul.mubr.msk.f32.gmra.mxu1 %vm232_vm5, %v87_v2  ;;  %699 = vmatprep.subr.mxu1 %v564_v34  ;;  %v342_v2 = vsub.s32 1, %v978_v59 }
  0xc7   :  { %321 = vmatprep.mubr.f32.mxu1 %v869_v1  ;;  %700 = vmatpush3.msra.mxu1 %v548_v35 }
  0xc8   :  { %701 = vmatprep.subr.mxu1 %v563_v36  ;;  %v343_v7 = vrot.slane %v334_v0, %v342_v2  ;;  %v554_v36 = vld [vmem:[#allocation8 + $0x98] sm:$0xff] }
  0xc9   :  { %702 = vmatpush3.msra.mxu1 %v547_v37  ;;  %v538_v37 = vld [vmem:[#allocation8 + $0x18] sm:$0xff] }
  0xca   :  { %692 = vmatmul.mubr.msk.f32.gmra.mxu1 %vm232_vm5, %v88_v3  ;;  %703 = vmatprep.subr.mxu1 %v562_v38  ;;  %v553_v38 = vld [vmem:[#allocation8 + $0x90] sm:$0xff] }
  0xcb   :  { %327 = vmatprep.mubr.f32.mxu1 %v869_v1  ;;  %v412_v1 = vld [vmem:[#allocation7 + $0x190] sm:$0xff]  ;;  %704 = vmatpush3.msra.mxu1 %v546_v39 }
  0xcc   :  { %483 = vmatpush2.msra.mxu0 %v412_v1  ;;  %705 = vmatprep.subr.mxu1 %v561_v40  ;;  %v537_v39 = vld [vmem:[#allocation8 + $0x10] sm:$0xff]  ;;  %v552_v40 = vld [vmem:[#allocation8 + $0x88] sm:$0xff] }
  0xcd   :  { %484 = vmatprep.subr.mxu0 %v411_v12  ;;  %706 = vmatpush3.msra.mxu1 %v545_v41  ;;  %v536_v41 = vld [vmem:[#allocation8 + $0x8] sm:$0xff] }
  0xce   :  { %693 = vmatmul.mubr.msk.f32.gmra.mxu1 %vm232_vm5, %v89_v4  ;;  %485 = vmatpush2.msra.mxu0 %v410_v13 }
  0xcf   :  { %486 = vmatprep.subr.mxu0 %v409_v14  ;;  %707 = vmatprep.subr.mxu1 %v560_v42  ;;  %v551_v42 = vld [vmem:[#allocation8 + $0x80] sm:$0xff] }
  0xd0   :  { %487 = vmatpush2.msra.mxu0 %v408_v15  ;;  %708 = vmatpush3.msra.mxu1 %v544_v43  ;;  %v535_v43 = vld [vmem:[#allocation8] sm:$0xff] }
  0xd1   :  { %488 = vmatprep.subr.mxu0 %v407_v16  ;;  %709 = vmatprep.subr.mxu1 %v559_v44  ;;  %v426_v44 = vld [vmem:[%s1007_s6] sm:$0x3] }
  0xd2   :  { %489 = vmatpush2.msra.mxu0 %v406_v17  ;;  %710 = vmatpush3.msra.mxu1 %v543_v45  ;;  %v431_v45 = vrot.slane %v426_v44, %v338_v63 }
  0xd3   :  { %490 = vmatprep.subr.mxu0 %v405_v18  ;;  %711 = vmatprep.subr.mxu1 %v558_v46  ;;  %v435_v46 = vrot.slane %v426_v44, %v342_v2 }
  0xd4   :  { %491 = vmatpush2.msra.mxu0 %v404_v19  ;;  %712 = vmatpush3.msra.mxu1 %v542_v48 }
  0xd5   :  { %492 = vmatprep.subr.mxu0 %v403_v20  ;;  %713 = vmatprep.subr.mxu1 %v557_v49 }
  0xd6   :  { %493 = vmatpush2.msra.mxu0 %v402_v21  ;;  %714 = vmatpush3.msra.mxu1 %v541_v50 }
  0xd7   :  { %494 = vmatprep.subr.mxu0 %v401_v22  ;;  %715 = vmatprep.subr.mxu1 %v556_v51 }
  0xd8   :  { %495 = vmatpush2.msra.mxu0 %v400_v23  ;;  %716 = vmatpush3.msra.mxu1 %v540_v52 }
  0xd9   :  { %496 = vmatprep.subr.mxu0 %v399_v24  ;;  %717 = vmatprep.subr.mxu1 %v555_v53 }
  0xda   :  { %497 = vmatpush2.msra.mxu0 %v398_v25  ;;  %718 = vmatpush3.msra.mxu1 %v539_v54 }
  0xdb   :  { %498 = vmatprep.subr.mxu0 %v397_v26  ;;  %719 = vmatprep.subr.mxu1 %v554_v36 }
  0xdc   :  { %499 = vmatpush2.msra.mxu0 %v396_v27  ;;  %720 = vmatpush3.msra.mxu1 %v538_v37 }
  0xdd   :  { %500 = vmatprep.subr.mxu0 %v395_v28  ;;  %721 = vmatprep.subr.mxu1 %v553_v38 }
  0xde   :  { %501 = vmatpush2.msra.mxu0 %v394_v29  ;;  %722 = vmatpush3.msra.mxu1 %v537_v39 }
  0xdf   :  { %723 = vmatprep.subr.mxu1 %v552_v40 }
  0xe0   :  { %724 = vmatpush3.msra.mxu1 %v536_v41 }
  0xe1   :  { %725 = vmatprep.subr.mxu1 %v551_v42 }
  0xe2   :  { %726 = vmatpush3.msra.mxu1 %v535_v43 }
 0x172   :  { %v209_v55 = vpop.f32.mrf.mxu1 }
 0x174   :  { %v211_v56 = vpop.f32.mrf.mxu1 }
 0x176   :  { %v215_v57 = vpop.f32.mrf.mxu1 }
 0x178   :  { %v217_v58 = vpop.f32.mrf.mxu1 }
 0x17a   :  { %v221_v60 = vpop.f32.mrf.mxu1 }
 0x17c   :  { %v223_v61 = vpop.f32.mrf.mxu1 }
 0x17e   :  { %v227_v62 = vpop.f32.mrf.mxu1 }
 0x180   :  { %v229_v3 = vpop.f32.mrf.mxu1 }
 0x182   :  { %v311_v4 = vpop.f32.mrf.mxu1 }
 0x183   :  { %v312_v6 = vadd.f32 %v311_v4, %v209_v55 }
 0x184   :  { %v313_v47 = vpop.f32.mrf.mxu1 }
 0x185   :  { %v314_v8 = vadd.f32 %v313_v47, %v211_v56  ;;  %v346_v9 = vadd.f32 %v339_v5, %v312_v6 }
 0x186   :  { %v317_v10 = vpop.f32.mrf.mxu1 }
 0x187   :  { %v318_v11 = vadd.f32 %v317_v10, %v215_v57  ;;  %v347_v1 = vadd.f32 %v343_v7, %v314_v8  ;;  %v354_v15 = vmax.f32 %v346_v9, 0.0  ;;  %v694_v9 = vld [vmem:[%s1009_s8] ss:$0 sm:$0xff]  ;;  %s832_s8 = scalar_lea.vmem %s669_s26, 512 }
 0x188   :  { %v319_v12 = vpop.f32.mrf.mxu1  ;;  %p833_p6 = scmp.ne.s32.totalorder %s669_s26, %s832_s8  ;;  %p838_p8 = scmp.lt.s32.totalorder %s832_s8, %s832_s8 }
 0x189   :  { %v320_v13 = vadd.f32 %v319_v12, %v217_v58  ;;  %v355_v14 = vmax.f32 %v347_v1, 0.0  ;;  %v348_v16 = vadd.f32 %v339_v5, %v318_v11 }
 0x18a   :  { %v323_v17 = vpop.f32.mrf.mxu1  ;;  %p839_p9 = por %p838_p8, %p837_p7 }
 0x18b   :  { %v349_v18 = vadd.f32 %v343_v7, %v320_v13  ;;  %v324_v19 = vadd.f32 %v323_v17, %v221_v60  ;;  %502 = vmatprep.mubr.f32.mxu0 %v355_v14  ;;  %v356_v23 = vmax.f32 %v348_v16, 0.0 }
 0x18c   :  { %v325_v20 = vpop.f32.mrf.mxu1  ;;  %503 = vmatmul.mubr.f32.vlgmr.msra.gmra.mxu0 %v354_v15  ;;  %p840_p10 = pnand %p839_p9, %p833_p6 }
 0x18d   :  { %v357_v21 = vmax.f32 %v349_v18, 0.0  ;;  %v326_v22 = vadd.f32 %v325_v20, %v223_v61  ;;  %v350_v24 = vadd.f32 %v339_v5, %v324_v19 }
 0x18e   :  { %v329_v25 = vpop.f32.mrf.mxu1 }
 0x18f   :  { %v351_v26 = vadd.f32 %v343_v7, %v326_v22  ;;  %v330_v27 = vadd.f32 %v329_v25, %v227_v62  ;;  %508 = vmatprep.mubr.f32.mxu0 %v357_v21  ;;  %v358_v31 = vmax.f32 %v350_v24, 0.0 }
 0x190   :  { %v331_v28 = vpop.f32.mrf.mxu1  ;;  %509 = vmatmul.mubr.f32.gmra.mxu0 %v356_v23 }
 0x191   :  { %v359_v29 = vmax.f32 %v351_v26, 0.0  ;;  %v332_v30 = vadd.f32 %v331_v28, %v229_v3  ;;  %v352_v32 = vadd.f32 %v339_v5, %v330_v27 }
 0x193   :  { %v353_v33 = vadd.f32 %v343_v7, %v332_v30  ;;  %514 = vmatprep.mubr.f32.mxu0 %v359_v29  ;;  %v360_v35 = vmax.f32 %v352_v32, 0.0 }
 0x194   :  { %515 = vmatmul.mubr.f32.gmra.mxu0 %v358_v31 }
 0x195   :  { %v361_v34 = vmax.f32 %v353_v33, 0.0 }
 0x197   :  { %520 = vmatprep.mubr.f32.mxu0 %v361_v34 }
 0x198   :  { %521 = vmatmul.mubr.f32.gmra.mxu0 %v360_v35 }
 0x24c   :  { %v504_v48 = vpop.f32.mrf.mxu0 }
 0x24d   :  { %v505_v49 = vadd.f32 %v504_v48, %v431_v45 }
 0x24e   :  { %v506_v50 = vpop.f32.mrf.mxu0 }
 0x24f   :  { %v507_v51 = vadd.f32 %v506_v50, %v435_v46  ;;  %v527_v54 = vmax.f32 %v505_v49, 0.0 }
 0x250   :  { %v510_v52 = vpop.f32.mrf.mxu0 }
 0x251   :  { %v528_v53 = vmax.f32 %v507_v51, 0.0  ;;  %v511_v55 = vadd.f32 %v510_v52, %v431_v45 }
 0x252   :  { %v512_v56 = vpop.f32.mrf.mxu0 }
 0x253   :  { %v513_v57 = vadd.f32 %v512_v56, %v435_v46  ;;  %638 = vmatprep.mubr.f32.mxu1 %v528_v53  ;;  %v529_v61 = vmax.f32 %v511_v55, 0.0 }
 0x254   :  { %v516_v58 = vpop.f32.mrf.mxu0  ;;  %639 = vmatmul.mubr.f32.vlgmr.msra.gmra.mxu1 %v527_v54 }
 0x255   :  { %v530_v60 = vmax.f32 %v513_v57, 0.0  ;;  %v517_v62 = vadd.f32 %v516_v58, %v431_v45 }
 0x256   :  { %v518_v0 = vpop.f32.mrf.mxu0 }
 0x257   :  { %v519_v59 = vadd.f32 %v518_v0, %v435_v46  ;;  %643 = vmatprep.mubr.f32.mxu1 %v530_v60  ;;  %v531_v3 = vmax.f32 %v517_v62, 0.0 }
 0x258   :  { %v522_v63 = vpop.f32.mrf.mxu0  ;;  %644 = vmatmul.mubr.f32.gmra.mxu1 %v529_v61 }
 0x259   :  { %v532_v2 = vmax.f32 %v519_v59, 0.0  ;;  %v523_v4 = vadd.f32 %v522_v63, %v431_v45 }
 0x25a   :  { %v524_v5 = vpop.f32.mrf.mxu0 }
 0x25b   :  { %v525_v6 = vadd.f32 %v524_v5, %v435_v46  ;;  %648 = vmatprep.mubr.f32.mxu1 %v532_v2  ;;  %v533_v47 = vmax.f32 %v523_v4, 0.0 }
 0x25c   :  { %649 = vmatmul.mubr.f32.gmra.mxu1 %v531_v3 }
 0x25d   :  { %v534_v7 = vmax.f32 %v525_v6, 0.0 }
 0x25f   :  { %653 = vmatprep.mubr.f32.mxu1 %v534_v7 }
 0x260   :  { %654 = vmatmul.mubr.f32.gmra.mxu1 %v533_v47 }
 0x314   :  { %v727_v8 = vpop.f32.mrf.mxu1 }
 0x316   :  { %v728_v10 = vpop.f32.mrf.mxu1 }
 0x317   :  { %v729_v11 = vadd.f32 %v728_v10, %v727_v8 }
 0x318   :  { %v730_v1 = vpop.f32.mrf.mxu1 }
 0x319   :  { %v641_v12 = vadd.f32 %v729_v11, %v694_v9 }
 0x31a   :  { %v731_v13 = vpop.f32.mrf.mxu1 }
 0x31b   :  { %659 = vst [vmem:[#allocation10] sm:$0xff] %v641_v12  ;;  %v732_v14 = vadd.f32 %v731_v13, %v730_v1 }
 0x31c   :  { %v733_v15 = vpop.f32.mrf.mxu1 }
 0x31d   :  { %v646_v16 = vadd.f32 %v732_v14, %v694_v9 }
 0x31e   :  { %v734_v17 = vpop.f32.mrf.mxu1 }
 0x31f   :  { %660 = vst [vmem:[#allocation10 + $0x8] sm:$0xff] %v646_v16  ;;  %v735_v18 = vadd.f32 %v734_v17, %v733_v15 }
 0x320   :  { %v736_v19 = vpop.f32.mrf.mxu1 }
 0x321   :  { %v651_v20 = vadd.f32 %v735_v18, %v694_v9 }
 0x322   :  { %v737_v21 = vpop.f32.mrf.mxu1 }
 0x323   :  { %661 = vst [vmem:[#allocation10 + $0x10] sm:$0xff] %v651_v20  ;;  %v738_v22 = vadd.f32 %v737_v21, %v736_v19 }
 0x325   :  { %v656_v23 = vadd.f32 %v738_v22, %v694_v9 }
 0x327   :  { %662 = vst [vmem:[#allocation10 + $0x18] sm:$0xff] %v656_v23 }
 0x328   :  { %843 = shalt.err (!%p840_p10)
}
 0x329   :  { %674 = dma.vmem_to_hbm [thread:$0]  %s669_s26, 512, %s1010_s9, [#allocation4], %s866_s2, %s866_s2, %s867_s28  }
 0x32a   :  { %858 = dma.done.wait [#allocation4], 512  }
 0x32b   :  { %859 = vsyncadd [#allocation4], 4294966784 }
 0x32c   :  { %678 = vsyncpa [#allocation3], 1 }
 0x32d   :  { %679 = vsyncpa [#allocation6], 1 }
 0x32e   :  { %680 = vsyncpa [#allocation9], 1 }
 0x32f   :  { %681 = vsyncpa [#allocation4], 1 }

</bundles_post_ra>
